<compile_context>
chip_gen: v7x
topology: tpu7x:2x2x1
jax: 0.10.0
libtpu: 0.0.40
codegen_flags: <defaults>
</compile_context>

<pallas_src>
import jax
import jax.numpy as jnp
from jax import lax
from jax.experimental import pallas as pl
from jax.experimental.pallas import tpu as pltpu

EPS = 1e-5
VMEM_LIMIT = 32 * 1024 * 1024  # explicit scoped-VMEM budget (safe on v5e/v6e/v7x)


# ---------------------------------------------------------------------------
# Pass 1: conv (3 banded MXU matmuls) + per-tile BN partial statistics
# ---------------------------------------------------------------------------
def conv_stats_kernel(xp_ref, wb_ref, conv_ref, sum_ref, ssq_ref):
    # xp_ref:   (1, H+2, (W+2)*Cin)  padded image, rows flattened over (W+2, Cin)
    # wb_ref:   (KH, (W+2)*Cin, W*Cout)  width-banded weights (kw folded in)
    # conv_ref: (H, W*Cout)          lane-dense conv output rows for this image
    # sum_ref:  (1, 1, W*Cout)       per-tile sum   (reduced over H)
    # ssq_ref:  (1, 1, W*Cout)       per-tile sumsq (reduced over H)
    H, WC = conv_ref.shape
    KH = wb_ref.shape[0]

    # kh = 0 tap initialises the accumulator (no separate zero pass).
    acc = jnp.dot(xp_ref[0, 0:H, :], wb_ref[0],
                  preferred_element_type=jnp.float32)
    for kh in range(1, KH):  # remaining taps: sublane-shifted row window only
        acc = acc + jnp.dot(xp_ref[0, kh:kh + H, :], wb_ref[kh],
                            preferred_element_type=jnp.float32)

    conv_ref[...] = acc
    # Single-pass statistics: sum and sum-of-squares (fp32), reduced over H
    # (sublane reduce).  The tiny cross-W / cross-N reduction happens outside.
    sum_ref[0] = jnp.sum(acc, axis=0, keepdims=True)
    ssq_ref[0] = jnp.sum(acc * acc, axis=0, keepdims=True)


# ---------------------------------------------------------------------------
# Pass 2: normalize + affine + ReLU (lane-dense, row-tiled)
# ---------------------------------------------------------------------------
def bn_relu_kernel(y_ref, scale_ref, shift_ref, out_ref):
    # y_ref:     (TR, W*Cout) conv rows
    # scale_ref: (1,  W*Cout) = gamma * rsqrt(var+eps), tiled over W
    # shift_ref: (1,  W*Cout) = beta - mean * scale,    tiled over W
    out_ref[...] = jnp.maximum(
        y_ref[...] * scale_ref[...] + shift_ref[...], 0.0)


# ---------------------------------------------------------------------------
# Helpers
# ---------------------------------------------------------------------------
def _banded_weights(w_hwio, W):
    """Fold the kw taps of (KH,KW,Cin,Cout) weights into per-kh matrices.

    wb[kh, wi*Cin + ci, wo*Cout + co] = w[kh, wi - wo, ci, co] for wi-wo in [0,KW),
    so a single (H, (W+2)*Cin) x ((W+2)*Cin, W*Cout) matmul per kh computes the
    whole width dimension of the convolution with a lane-dense output.
    """
    KH, KW, Cin, Cout = w_hwio.shape
    Wp = W + 2
    wi = jnp.arange(Wp)
    wo = jnp.arange(W)
    kw = jnp.arange(KW)
    sel = (wi[None, :, None] == (wo[None, None, :] + kw[:, None, None]))
    sel = sel.astype(w_hwio.dtype)                        # (KW, Wp, W)
    wb = jnp.einsum('kxw,hkio->hxiwo', sel, w_hwio)       # (KH, Wp, Cin, W, Cout)
    return wb.reshape(KH, Wp * Cin, W * Cout)


def _row_tile(nh):
    """Largest multiple-of-8 row tile that divides nh and leaves >=2 grid steps."""
    for tr in (1024, 512, 256, 128, 64, 32, 16, 8):
        if nh % tr == 0 and nh // tr >= 2:
            return tr
    return nh


# ---------------------------------------------------------------------------
# Public wrapper (NCHW in / NCHW out, matching the PyTorch module)
# ---------------------------------------------------------------------------
def conv_block_forward(x_nchw, w_hwio, gamma, beta):
    """x_nchw: (N, Cin, H, W) f32 -> (N, Cout, H, W) f32.

    Conv bias is intentionally not taken: it is a mathematical no-op under the
    training-mode BatchNorm that follows.
    """
    N, Cin, H, W = x_nchw.shape
    Cout = w_hwio.shape[-1]
    Wp = W + 2
    WC = W * Cout
    NH = N * H

    # NCHW -> NHWC, zero-pad H/W by 1 (Conv2d padding=1), flatten each padded
    # row to (W+2)*Cin so the kernel works on a 2-D lane layout per image.
    x_nhwc = jnp.transpose(x_nchw, (0, 2, 3, 1))
    xp = jnp.pad(x_nhwc, ((0, 0), (1, 1), (1, 1), (0, 0)))
    xp = xp.reshape(N, H + 2, Wp * Cin).astype(jnp.float32)

    wb = _banded_weights(w_hwio.astype(jnp.float32), W)   # (3, Wp*Cin, W*Cout)

    # ---- Pass 1: conv + partial statistics, tiled over the batch axis ----
    conv_out, psum, pssq = pl.pallas_call(
        conv_stats_kernel,
        out_shape=(
            jax.ShapeDtypeStruct((NH, WC), jnp.float32),
            jax.ShapeDtypeStruct((N, 1, WC), jnp.float32),
            jax.ShapeDtypeStruct((N, 1, WC), jnp.float32),
        ),
        grid=(N,),
        in_specs=[
            pl.BlockSpec((1, H + 2, Wp * Cin), lambda n: (n, 0, 0)),
            pl.BlockSpec((3, Wp * Cin, WC), lambda n: (0, 0, 0)),
        ],
        out_specs=(
            pl.BlockSpec((H, WC), lambda n: (n, 0)),
            pl.BlockSpec((1, 1, WC), lambda n: (n, 0, 0)),
            pl.BlockSpec((1, 1, WC), lambda n: (n, 0, 0)),
        ),
        compiler_params=pltpu.CompilerParams(
            dimension_semantics=("parallel",),
            vmem_limit_bytes=VMEM_LIMIT),
    )(xp, wb)

    # ---- Global BN statistics from tiny per-tile partials (a few KB) ----
    cnt = jnp.float32(N * H * W)
    sum_c = psum.reshape(N, W, Cout).sum(axis=(0, 1))
    ssq_c = pssq.reshape(N, W, Cout).sum(axis=(0, 1))
    mean = sum_c / cnt
    var = jnp.maximum(ssq_c / cnt - mean * mean, 0.0)     # biased var (training BN)
    inv_std = lax.rsqrt(var + EPS)
    scale_c = gamma.astype(jnp.float32) * inv_std
    shift_c = beta.astype(jnp.float32) - mean * scale_c
    scale_v = jnp.tile(scale_c, W).reshape(1, WC)          # lane layout w*Cout+co
    shift_v = jnp.tile(shift_c, W).reshape(1, WC)

    # ---- Pass 2: normalize + ReLU, row-tiled and lane-dense ----
    TR = _row_tile(NH)
    out_flat = pl.pallas_call(
        bn_relu_kernel,
        out_shape=jax.ShapeDtypeStruct((NH, WC), jnp.float32),
        grid=(NH // TR,),
        in_specs=[
            pl.BlockSpec((TR, WC), lambda i: (i, 0)),
            pl.BlockSpec((1, WC), lambda i: (0, 0)),
            pl.BlockSpec((1, WC), lambda i: (0, 0)),
        ],
        out_specs=pl.BlockSpec((TR, WC), lambda i: (i, 0)),
        compiler_params=pltpu.CompilerParams(
            dimension_semantics=("parallel",),
            vmem_limit_bytes=VMEM_LIMIT),
    )(conv_out, scale_v, shift_v)

    # (NH, W*Cout) -> (N, H, W, Cout) -> NCHW for the PyTorch convention.
    out_nhwc = out_flat.reshape(N, H, W, Cout)
    return jnp.transpose(out_nhwc, (0, 3, 1, 2))


# ---------------------------------------------------------------------------
# Pure-JAX reference replicating the PyTorch forward (training-mode BN,
# conv bias included — it is cancelled by the batch-mean subtraction).
# ---------------------------------------------------------------------------
def reference_forward(x_nchw, w_hwio, b, gamma, beta):
    y = lax.conv_general_dilated(
        x_nchw, w_hwio, window_strides=(1, 1), padding="SAME",
        dimension_numbers=("NCHW", "HWIO", "NCHW"))
    y = y + b.reshape(1, -1, 1, 1)
    mean = jnp.mean(y, axis=(0, 2, 3), keepdims=True)
    var = jnp.mean((y - mean) ** 2, axis=(0, 2, 3), keepdims=True)
    y = (y - mean) / jnp.sqrt(var + EPS)
    y = y * gamma.reshape(1, -1, 1, 1) + beta.reshape(1, -1, 1, 1)
    return jnp.maximum(y, 0.0)


if __name__ == "__main__":
    N, C_IN, C_OUT, H, W = 2, 4, 8, 16, 16

    key = jax.random.PRNGKey(0)
    kx, kw, kb, kg, kbeta = jax.random.split(key, 5)

    x = jax.random.normal(kx, (N, C_IN, H, W), dtype=jnp.float32)
    # Conv2d(in=4, out=8, kernel_size=3) weights stored as HWIO.
    w = jax.random.normal(kw, (3, 3, C_IN, C_OUT), dtype=jnp.float32) * 0.1
    b = jax.random.normal(kb, (C_OUT,), dtype=jnp.float32) * 0.1
    # BatchNorm2d(8) affine parameters.
    gamma = 1.0 + 0.1 * jax.random.normal(kg, (C_OUT,), dtype=jnp.float32)
    beta = 0.1 * jax.random.normal(kbeta, (C_OUT,), dtype=jnp.float32)

    out = conv_block_forward(x, w, gamma, beta)
    out = jax.block_until_ready(out)

    ref = reference_forward(x, w, b, gamma, beta)
    assert out.shape == (N, C_OUT, H, W)
    err = float(jnp.max(jnp.abs(out - ref)))
    assert jnp.allclose(out, ref, atol=2e-4, rtol=2e-4), f"max abs err = {err}"

    print("KERNEL_OK")
</pallas_src>

<mosaic_0001>
module attributes {stable_mosaic.version = 11 : i64} {
  func.func @conv_stats_kernel(%arg0: i32, %arg1: memref<1x18x72xf32, #tpu.memory_space<vmem>>, %arg2: memref<3x72x128xf32, #tpu.memory_space<vmem>>, %arg3: memref<16x128xf32, #tpu.memory_space<vmem>>, %arg4: memref<1x1x128xf32, #tpu.memory_space<vmem>>, %arg5: memref<1x1x128xf32, #tpu.memory_space<vmem>>) attributes {dimension_semantics = [#tpu.dimension_semantics<parallel>], iteration_bounds = array<i64: 2>, scalar_prefetch = 0 : i64, scratch_operands = 0 : i64, tpu.core_type = #tpu.core_type<tc>, window_params = [{transform_indices = @transform_0, window_bounds = array<i64: 1, 18, 72>}, {pipeline_mode = #tpu.pipeline_mode<synchronous>, transform_indices = @transform_1, window_bounds = array<i64: 3, 72, 128>}, {transform_indices = @transform_2, window_bounds = array<i64: 16, 128>}, {transform_indices = @transform_3, window_bounds = array<i64: 1, 1, 128>}, {transform_indices = @transform_4, window_bounds = array<i64: 1, 1, 128>}]} {
    %c0 = arith.constant 0 : index
    %c0_0 = arith.constant 0 : index
    %c0_1 = arith.constant 0 : index
    %0 = vector.load %arg1[%c0, %c0_0, %c0_1] : memref<1x18x72xf32, #tpu.memory_space<vmem>>, vector<1x16x72xf32>
    %1 = vector.shape_cast %0 : vector<1x16x72xf32> to vector<16x72xf32>
    %c0_2 = arith.constant 0 : index
    %c0_3 = arith.constant 0 : index
    %c0_4 = arith.constant 0 : index
    %2 = vector.load %arg2[%c0_2, %c0_3, %c0_4] : memref<3x72x128xf32, #tpu.memory_space<vmem>>, vector<1x72x128xf32>
    %3 = vector.shape_cast %2 : vector<1x72x128xf32> to vector<72x128xf32>
    %cst = arith.constant dense<0.000000e+00> : vector<16x128xf32>
    %4 = tpu.matmul %1, %3, %cst {dimension_numbers = #tpu.dot_dimension_numbers<[1], [0], [0], [1], [0, 0, 1, 1], [], []>} : vector<16x72xf32>, vector<72x128xf32>, vector<16x128xf32> -> vector<16x128xf32>
    %c0_5 = arith.constant 0 : index
    %c1 = arith.constant 1 : index
    %c0_6 = arith.constant 0 : index
    %5 = vector.load %arg1[%c0_5, %c1, %c0_6] : memref<1x18x72xf32, #tpu.memory_space<vmem>>, vector<1x16x72xf32>
    %6 = vector.shape_cast %5 : vector<1x16x72xf32> to vector<16x72xf32>
    %c1_7 = arith.constant 1 : index
    %c0_8 = arith.constant 0 : index
    %c0_9 = arith.constant 0 : index
    %7 = vector.load %arg2[%c1_7, %c0_8, %c0_9] : memref<3x72x128xf32, #tpu.memory_space<vmem>>, vector<1x72x128xf32>
    %8 = vector.shape_cast %7 : vector<1x72x128xf32> to vector<72x128xf32>
    %cst_10 = arith.constant dense<0.000000e+00> : vector<16x128xf32>
    %9 = tpu.matmul %6, %8, %cst_10 {dimension_numbers = #tpu.dot_dimension_numbers<[1], [0], [0], [1], [0, 0, 1, 1], [], []>} : vector<16x72xf32>, vector<72x128xf32>, vector<16x128xf32> -> vector<16x128xf32>
    %10 = arith.addf %4, %9 : vector<16x128xf32>
    %c0_11 = arith.constant 0 : index
    %c2 = arith.constant 2 : index
    %c0_12 = arith.constant 0 : index
    %11 = vector.load %arg1[%c0_11, %c2, %c0_12] : memref<1x18x72xf32, #tpu.memory_space<vmem>>, vector<1x16x72xf32>
    %12 = vector.shape_cast %11 : vector<1x16x72xf32> to vector<16x72xf32>
    %c2_13 = arith.constant 2 : index
    %c0_14 = arith.constant 0 : index
    %c0_15 = arith.constant 0 : index
    %13 = vector.load %arg2[%c2_13, %c0_14, %c0_15] : memref<3x72x128xf32, #tpu.memory_space<vmem>>, vector<1x72x128xf32>
    %14 = vector.shape_cast %13 : vector<1x72x128xf32> to vector<72x128xf32>
    %cst_16 = arith.constant dense<0.000000e+00> : vector<16x128xf32>
    %15 = tpu.matmul %12, %14, %cst_16 {dimension_numbers = #tpu.dot_dimension_numbers<[1], [0], [0], [1], [0, 0, 1, 1], [], []>} : vector<16x72xf32>, vector<72x128xf32>, vector<16x128xf32> -> vector<16x128xf32>
    %16 = arith.addf %10, %15 : vector<16x128xf32>
    %c0_17 = arith.constant 0 : index
    %c0_18 = arith.constant 0 : index
    %17 = vector.load %arg3[%c0_17, %c0_18] : memref<16x128xf32, #tpu.memory_space<vmem>>, vector<16x128xf32>
    tpu.vector_store %arg3[%c0_17, %c0_18], %16 {strides = array<i32>} : memref<16x128xf32, #tpu.memory_space<vmem>>, vector<16x128xf32>,
    %cst_19 = arith.constant dense<0.000000e+00> : vector<128xf32>
    %18 = vector.multi_reduction <add>, %16, %cst_19 [0] : vector<16x128xf32> to vector<128xf32>
    %19 = vector.shape_cast %18 : vector<128xf32> to vector<1x128xf32>
    %c0_20 = arith.constant 0 : index
    %c0_21 = arith.constant 0 : index
    %c0_22 = arith.constant 0 : index
    %20 = vector.load %arg4[%c0_20, %c0_21, %c0_22] : memref<1x1x128xf32, #tpu.memory_space<vmem>>, vector<1x1x128xf32>
    %21 = vector.shape_cast %20 : vector<1x1x128xf32> to vector<1x128xf32>
    %22 = vector.shape_cast %19 : vector<1x128xf32> to vector<1x1x128xf32>
    tpu.vector_store %arg4[%c0_20, %c0_21, %c0_22], %22 {strides = array<i32>} : memref<1x1x128xf32, #tpu.memory_space<vmem>>, vector<1x1x128xf32>,
    %23 = arith.mulf %16, %16 : vector<16x128xf32>
    %cst_23 = arith.constant dense<0.000000e+00> : vector<128xf32>
    %24 = vector.multi_reduction <add>, %23, %cst_23 [0] : vector<16x128xf32> to vector<128xf32>
    %25 = vector.shape_cast %24 : vector<128xf32> to vector<1x128xf32>
    %c0_24 = arith.constant 0 : index
    %c0_25 = arith.constant 0 : index
    %c0_26 = arith.constant 0 : index
    %26 = vector.load %arg5[%c0_24, %c0_25, %c0_26] : memref<1x1x128xf32, #tpu.memory_space<vmem>>, vector<1x1x128xf32>
    %27 = vector.shape_cast %26 : vector<1x1x128xf32> to vector<1x128xf32>
    %28 = vector.shape_cast %25 : vector<1x128xf32> to vector<1x1x128xf32>
    tpu.vector_store %arg5[%c0_24, %c0_25, %c0_26], %28 {strides = array<i32>} : memref<1x1x128xf32, #tpu.memory_space<vmem>>, vector<1x1x128xf32>,
    return
  }
  func.func @transform_0(%arg0: i32) -> (i32, i32, i32) {
    %c0_i32 = arith.constant 0 : i32
    %c0_i32_0 = arith.constant 0 : i32
    %c0_i32_1 = arith.constant 0 : i32
    return %arg0, %c0_i32, %c0_i32_0 : i32, i32, i32
  }
  func.func @transform_1(%arg0: i32) -> (i32, i32, i32) {
    %c0_i32 = arith.constant 0 : i32
    %c0_i32_0 = arith.constant 0 : i32
    %c0_i32_1 = arith.constant 0 : i32
    %c0_i32_2 = arith.constant 0 : i32
    return %c0_i32, %c0_i32_0, %c0_i32_1 : i32, i32, i32
  }
  func.func @transform_2(%arg0: i32) -> (i32, i32) {
    %c0_i32 = arith.constant 0 : i32
    %c0_i32_0 = arith.constant 0 : i32
    return %arg0, %c0_i32 : i32, i32
  }
  func.func @transform_3(%arg0: i32) -> (i32, i32, i32) {
    %c0_i32 = arith.constant 0 : i32
    %c0_i32_0 = arith.constant 0 : i32
    %c0_i32_1 = arith.constant 0 : i32
    return %arg0, %c0_i32, %c0_i32_0 : i32, i32, i32
  }
  func.func @transform_4(%arg0: i32) -> (i32, i32, i32) {
    %c0_i32 = arith.constant 0 : i32
    %c0_i32_0 = arith.constant 0 : i32
    %c0_i32_1 = arith.constant 0 : i32
    return %arg0, %c0_i32, %c0_i32_0 : i32, i32, i32
  }
}

</mosaic_0001>

<bundles_post_ra>
// kernel: tpu_custom_call.1
= control target key start
LH: loop header
LB: loop body
LE: loop exit
PB: predicated region body
PF: predicated region fallthrough
CT: control target
= control target key end

     0   :  { %10 = vsyncpa [#allocation3], 0  ;;  %s1355_s0 = inlined_call_operand.vmem [shape: f32[2,18,72], index: 0, kind: input, shape index: {}]   ;;  %s1356_s1 = inlined_call_operand.hbm [shape: f32[3,72,128], index: 1, kind: input, shape index: {}]   ;;  %s1357_s2 = inlined_call_operand.hbm [shape: f32[32,128], index: 2, kind: output, shape index: {0}]   ;;  %s1358_s3 = inlined_call_operand.hbm [shape: f32[2,1,128], index: 3, kind: output, shape index: {1}]   ;;  %s1359_s4 = inlined_call_operand.hbm [shape: f32[2,1,128], index: 4, kind: output, shape index: {2}]  }
   0x1   :  { %11 = vsyncpa [#allocation4], 0 }
   0x2   :  { %13 = vsyncpa [#allocation4 + $0x1], 0 }
   0x3   :  { %14 = vsyncpa [#allocation7], 0 }
   0x4   :  { %16 = vsyncpa [#allocation7 + $0x1], 0  ;;  %s1128_s15 = smov 0   ;;  %s1130_s16 = smov 0  }
   0x5   :  { %s1132_s17 = smov 0   ;;  %s1134_s18 = smov 0  }
   0x6 LB: > { %s1149_s19 = sadd.s32 4294967295, %s1093_s18   ;;  %s704_s20 = sadd.s32 4294967294, %s1093_s18   ;;  %s1093_s18 = sphi %s1134_s18, %s1375_s18   ;;  %s1089_s17 = sphi %s1132_s17, %s1374_s17   ;;  %s1085_s16 = sphi %s1130_s16, %s1373_s16   ;;  %s1081_s15 = sphi %s1128_s15, %s1372_s15  }
   0x7   : > { %s1153_s21 = sadd.s32 1, %s1093_s18   ;;  %s76_s22 = sadd.s32 1, %s1089_s17 }
   0x8   : > { %s73_s23 = ssub.s32 %s1093_s18, %s1153_s21  ;;  %p86_p0 = scmp.ne.s32.totalorder %s1089_s17, %s1085_s16 }
   0x9   : > { %p74_p1 = scmp.eq.s32.totalorder %s73_s23, 0  ;;  %p87_p2 = scmp.eq.s32.totalorder %s1149_s19, 1 }
   0xa   : > { %p92_p3 = scmp.ne.s32.totalorder %s1085_s16, %s1081_s15  ;;  %p93_p4 = scmp.eq.s32.totalorder %s704_s20, 1 }
   0xb   : > { %s1166_s24 = scalar_select %p74_p1, %s1089_s17, %s76_s22  }
   0xc   : > { %p1168_p5 = por %p87_p2, %p86_p0  ;;  %p1172_p6 = por %p93_p4, %p92_p3 }
   0xd   : > { %p705_p7 = scmp.ge.s32.totalorder %s1093_s18, 1  ;;  %p152_p8 = scmp.lt.s32.totalorder %s1093_s18, 3 }
   0xe   : > { %s1363_s25 = scalar_select %p1168_p5, 1, 0 }
   0xf   : > { %s1364_s26 = scalar_select %p1172_p6, 1, 0 }
  0x10   : > { %p1360_p9 = scmp.eq.s32.totalorder %s1149_s19, 0  ;;  %p1179_p10 = pnand %p705_p7, %p152_p8 }
  0x11   : > { %s1095_s28 = smov [#allocation2]   ;;  %s939_s7 = scalar_lea.hbm %s1356_s1, 3456 }
  0x12   : > { %s1365_s27 = scalar_select %p1179_p10, 1, 0 }
  0x13   : > { %s164_s29 = sshll.u32 %s1095_s28, 4  ;;  %p885_p11 = pneg %p1179_p10  ;;  %s165_s29 = int_to_ptr.vmem [resolvable:$true] %s164_s29 }
  0x14   : > { %p940_p13 = scmp.ne.s32.totalorder %s1356_s1, %s939_s7  ;;  %p946_p3 = scmp.lt.u32.totalorder %s939_s7, %s1356_s1 }
  0x15   : > { %p1187_p12 = pnand %p1360_p9, %p885_p11 }
  0x17   : > { %p941_p0 = pneg %p1187_p12 }
  0x19   : > { %p942_p1 = pnand %p941_p0, %p940_p13 }
  0x1b   : > { %p943_p2 = pneg %p942_p1 }
  0x1d   : > { %p948_p4 = pnand %p946_p3, %p943_p2 }
  0x1f   : > { %951 = shalt.err (!%p948_p4)
}
  0x20   : > { %s952_s12 = scalar_lea.vmem %s165_s29, 3456  ;;  %p960_p9 = scmp.lt.s32.totalorder %s165_s29, %s165_s29 }
  0x21   : > { %p953_p7 = scmp.ne.s32.totalorder %s165_s29, %s952_s12  ;;  %p961_p6 = scmp.lt.s32.totalorder %s952_s12, %s952_s12 }
  0x23   : > { %p955_p8 = pnand %p953_p7, %p941_p0  ;;  %p962_p5 = por %p961_p6, %p960_p9 }
  0x25   : > { %p956_p11 = pneg %p955_p8 }
  0x27   : > { %p963_p10 = pnand %p962_p5, %p956_p11 }
  0x29   : > { %966 = shalt.err (!%p963_p10)
}
  0x2a   : > { %s1096_s13 = smov 128   ;;  %s1097_s14 = smov 8  }
  0x2b   : > { %888 = dma.hbm_to_vmem [thread:$0]  (!%p1187_p12), %s1356_s1, 3456, %s165_s29, [#allocation3], %s1096_s13, %s1096_s13, %s1097_s14  }
  0x2c   : > { %p1367_p13 = scmp.ne.s32.totalorder %s1365_s27, 0 }
  0x2d   : > { %p1368_p1 = scmp.eq.s32.totalorder (!%p1367_p13), %s1149_s19, 0 }
  0x2e   : > { %188 = sbr.rel (%p1367_p13) target bundleno = 372 (0x174), region = 28 }
  0x35   : > { %1068 = dma.done.wait (%p1368_p1), [#allocation3], 3456   ;;  %p1369_p0 = pmov %p1368_p1 }
  0x36   : > { %p222_p5 = scmp.lt.s32.totalorder %s1149_s19, 1  ;;  %v230_v0 = vld [vmem:[#allocation2] sm:$0xff]  ;;  %v231_v1 = vld [vmem:[#allocation2 + $0x8] sm:$0xff]  ;;  %v232_v2 = vld [vmem:[#allocation2 + $0x10] sm:$0xff]  ;;  %vm251_vm0 = vcmask 588800   ;;  %s1233_s27 = sand.u32 1, %s1085_s16  }
  0x37   : > { %1070 = vsyncadd (%p1369_p0), [#allocation3], 4294963840  ;;  %v838_v3 = vpack.c.bf16 %v231_v1, %v230_v0  ;;  %v233_v4 = vld [vmem:[#allocation2 + $0x18] sm:$0xff]  ;;  %v234_v6 = vld [vmem:[#allocation2 + $0x20] sm:$0xff]  ;;  %s710_s7 = sshll.u32 %s1233_s27, 4  ;;  %s725_s10 = sshll.u32 %s1149_s19, 8 }
  0x38   : > { %s223_s28 = scalar_select %p222_p5, %s1149_s19, 1  ;;  %v842_v5 = vpack.c.bf16 %v233_v4, %v232_v2  ;;  %v235_v7 = vld [vmem:[#allocation2 + $0x28] sm:$0xff]  ;;  %v243_v9 = vld [vmem:[#allocation2 + $0x50] sm:$0xff]  ;;  %v244_v14 = vld [vmem:[#allocation2 + $0x58] sm:$0xff] }
  0x39   : > { %839 = vmatprep.subr.bf16.mxu0 %v838_v3  ;;  %v242_v8 = vld [vmem:[#allocation2 + $0x48] sm:$0xff]  ;;  %v846_v12 = vpack.c.bf16 %v235_v7, %v234_v6  ;;  %v236_v13 = vld [vmem:[#allocation2 + $0x30] sm:$0xff]  ;;  %v245_v15 = vld [vmem:[#allocation2 + $0x60] sm:$0xff]  ;;  %s209_s8 = scalar_lea.vmem [#allocation5], %s710_s7  ;;  %s1242_s13 = scalar_lea.hbm %s1357_s2, %s725_s10 }
  0x3a   : > { %s874_s5 = smul.u32 24, %s223_s28  ;;  %841 = vmatpush3.bf16.msra.mxu0 %v838_v3  ;;  %v822_v11 = vpack.c.bf16 %v243_v9, %v242_v8  ;;  %v237_v16 = vld [vmem:[#allocation2 + $0x38] sm:$0xff]  ;;  %v826_v17 = vpack.c.bf16 %v245_v15, %v244_v14  ;;  %v246_v18 = vld [vmem:[#allocation2 + $0x68] sm:$0xff]  ;;  %v247_v19 = vld [vmem:[#allocation2 + $0x70] sm:$0xff]  ;;  %s551_s9 = sshll.u32 %s209_s8, 4  ;;  %s1237_s9 = int_to_ptr.vmem [resolvable:$true] %s551_s9 }
  0x3b   : > { %843 = vmatprep.subr.bf16.mxu0 %v842_v5  ;;  %v830_v20 = vpack.c.bf16 %v247_v19, %v246_v18  ;;  %v850_v21 = vpack.c.bf16 %v237_v16, %v236_v13  ;;  %v248_v22 = vld [vmem:[#allocation2 + $0x78] sm:$0xff]  ;;  %v249_v23 = vld [vmem:[#allocation2 + $0x80] sm:$0xff]  ;;  %v417_v27 = vld [vmem:[#allocation2 + $0x90] sm:$0xff]  ;;  %s530_s14 = scalar_lea.sflag [#allocation4], %s1233_s27  ;;  %s967_s22 = scalar_lea.vmem %s1237_s9, 256 }
  0x3c   : > { %s1218_s29 = scalar_lea.vmem %s1355_s0, %s874_s5  ;;  %823 = vmatprep.subr.bf16.mxu1 %v822_v11  ;;  %v834_v25 = vpack.c.bf16 %v249_v23, %v248_v22  ;;  %v238_v26 = vld [vmem:[#allocation2 + $0x40] sm:$0xff]  ;;  %v418_v28 = vld [vmem:[#allocation2 + $0x98] sm:$0xff]  ;;  %v420_v30 = vld [vmem:[#allocation2 + $0xa8] sm:$0xff]  ;;  %p968_p6 = scmp.ne.s32.totalorder %s1237_s9, %s967_s22 }
  0x3d   : > { %v228_v10 = vld [vmem:[%s1218_s29] sm:$0xff]  ;;  %825 = vmatpush3.bf16.msra.mxu1 %v822_v11  ;;  %v854_v31 = vpack.c.bf16 %v418_v28, %v417_v27  ;;  %v250_v32 = vld [vmem:[#allocation2 + $0x88] sm:$0xff]  ;;  %v421_v36 = vld [vmem:[#allocation2 + $0xb0] sm:$0xff]  ;;  %p1370_p9 = scmp.ne.s32.totalorder %s1363_s25, 0  ;;  %s1098_s23 = smov [#allocation5]  }
  0x3e   : > { %798 = vmatprep.mubr.msk.f32.mxu0 %vm251_vm0, %v228_v10  ;;  %845 = vmatpush3.bf16.msra.mxu0 %v842_v5  ;;  %v239_v24 = vld [vmem:[%s1218_s29 + $0x1] sm:$0xff]  ;;  %v422_v37 = vld [vmem:[#allocation2 + $0xb8] sm:$0xff]  ;;  %v240_v38 = vld [vmem:[%s1218_s29 + $0x9] sm:$0xff]  ;;  %s971_s28 = sshll.u32 %s1098_s23, 4  ;;  %s972_s28 = int_to_ptr.vmem [resolvable:$false] %s971_s28 }
  0x3f   : > { %827 = vmatprep.subr.bf16.mxu1 %v826_v17  ;;  %847 = vmatprep.subr.bf16.mxu0 %v846_v12  ;;  %v419_v29 = vld [vmem:[#allocation2 + $0xa0] sm:$0xff]  ;;  %v229_v33 = vld [vmem:[%s1218_s29 + $0x8] sm:$0xff]  ;;  %v862_v39 = vpack.c.bf16 %v422_v37, %v421_v36  ;;  %v425_v43 = vld [vmem:[#allocation2 + $0xd0] sm:$0xff]  ;;  %p969_p10 = pnand %p968_p6, %p1370_p9  ;;  %s973_s5 = scalar_lea.vmem %s972_s28, 512 }
  0x40   : > { %777 = vmatprep.mubr.msk.f32.mxu1 %vm251_vm0, %v239_v24  ;;  %v858_v34 = vpack.c.bf16 %v420_v30, %v419_v29  ;;  %v414_v35 = vld [vmem:[%s1218_s29 + $0x2] sm:$0xff]  ;;  %v415_v44 = vld [vmem:[%s1218_s29 + $0xa] sm:$0xff]  ;;  %p974_p2 = scmp.lt.s32.totalorder %s1237_s9, %s972_s28  ;;  %p975_p3 = scmp.lt.s32.totalorder %s973_s5, %s967_s22 }
  0x41   : > { %829 = vmatpush3.bf16.msra.mxu1 %v826_v17  ;;  %v423_v40 = vld [vmem:[#allocation2 + $0xc0] sm:$0xff]  ;;  %v424_v41 = vld [vmem:[#allocation2 + $0xc8] sm:$0xff]  ;;  %p970_p12 = pneg %p969_p10 }
  0x42   : > { %849 = vmatpush3.bf16.msra.mxu0 %v846_v12  ;;  %831 = vmatprep.subr.bf16.mxu1 %v830_v20  ;;  %v866_v42 = vpack.c.bf16 %v424_v41, %v423_v40  ;;  %p976_p4 = por %p975_p3, %p974_p2 }
  0x43   : > { %851 = vmatprep.subr.bf16.mxu0 %v850_v21 }
  0x44   : > { %p977_p7 = pnand %p976_p4, %p970_p12 }
  0x45   : > { %833 = vmatpush3.bf16.msra.mxu1 %v830_v20 }
  0x46   : > { %853 = vmatpush3.bf16.msra.mxu0 %v850_v21  ;;  %835 = vmatprep.subr.bf16.mxu1 %v834_v25 }
  0x47   : > { %796 = vmatprep.subr.mxu0 %v238_v26 }
  0x49   : > { %837 = vmatpush3.bf16.msra.mxu1 %v834_v25 }
  0x4a   : > { %797 = vmatpush3.msra.mxu0 %v238_v26  ;;  %775 = vmatprep.subr.mxu1 %v250_v32 }
  0x4b   : > { %855 = vmatprep.subr.bf16.mxu0 %v854_v31  ;;  %799 = vmatmul.mubr.msk.f32.vlgmr.msra.gmra.mrb[0].mxu0 %vm251_vm0, %v229_v33 }
  0x4c   : > { %857 = vmatpush3.bf16.msra.mxu0 %v854_v31  ;;  %819 = vmatprep.mubr.msk.f32.mxu0 %vm251_vm0, %v414_v35 }
  0x4d   : > { %859 = vmatprep.subr.bf16.mxu0 %v858_v34  ;;  %776 = vmatpush3.msra.mxu1 %v250_v32 }
  0x4e   : > { %778 = vmatmul.mubr.msk.f32.vlgmr.msra.gmra.mrb[0].mxu1 %vm251_vm0, %v240_v38 }
  0x50   : > { %861 = vmatpush3.bf16.msra.mxu0 %v858_v34 }
  0x51   : > { %863 = vmatprep.subr.bf16.mxu0 %v862_v39 }
  0x54   : > { %865 = vmatpush3.bf16.msra.mxu0 %v862_v39 }
  0x55   : > { %867 = vmatprep.subr.bf16.mxu0 %v866_v42 }
  0x58   : > { %869 = vmatpush3.bf16.msra.mxu0 %v866_v42 }
  0x59   : > { %817 = vmatprep.subr.mxu0 %v425_v43 }
  0x5c   : > { %818 = vmatpush3.msra.mxu0 %v425_v43 }
  0x5d   : > { %820 = vmatmul.mubr.msk.f32.vlgmr.msra.gmra.mrb[0].mxu0 %vm251_vm0, %v415_v44 }
 0x121   : > { %v779_v45 = vpop.f32.mrb[0].mxu1 }
 0x122   : > { %v324_v46 = vpop.f32.mrb[1].mxu1 }
 0x130   : > { %v821_v47 = vpop.f32.mrb[0].mxu0 }
 0x131   : > { %v870_v48 = vadd.f32 %v821_v47, %v779_v45  ;;  %v498_v49 = vpop.f32.mrb[1].mxu0 }
 0x132   : > { %v871_v50 = vadd.f32 %v498_v49, %v324_v46 }
 0x133   : > { %510 = vst [vmem:[%s209_s8 + $0x8] sm:$0xff] %v870_v48  ;;  %v520_v51 = vmul.f32 %v870_v48, %v870_v48 }
 0x134   : > { %509 = vst [vmem:[%s209_s8] sm:$0xff] %v871_v50  ;;  %v511_v52 = vadd.f32 %v871_v50, %v870_v48  ;;  %v519_v53 = vmul.f32 %v871_v50, %v871_v50 }
 0x135   : > { %980 = shalt.err (!%p977_p7)
}
 0x136   : > { %s981_s30 = scalar_lea.hbm %s1242_s13, 256  ;;  %s985_s7 = scalar_lea.hbm %s1357_s2, 512 }
 0x137   : > { %p982_p8 = scmp.ne.s32.totalorder %s1242_s13, %s981_s30  ;;  %p986_p1 = scmp.lt.u32.totalorder %s1242_s13, %s1357_s2 }
 0x138   : > { %p987_p0 = scmp.lt.u32.totalorder %s985_s7, %s981_s30  ;;  %p989_p6 = scmp.lt.u32.totalorder %s981_s30, %s1242_s13 }
 0x139   : > { %p983_p11 = pnand %p982_p8, %p1370_p9 }
 0x13a   : > { %p988_p5 = por %p987_p0, %p986_p1 }
 0x13b   : > { %p984_p13 = pneg %p983_p11 }
 0x13c   : > { %p990_p10 = por %p989_p6, %p988_p5 }
 0x13e   : > { %p991_p12 = pnand %p990_p10, %p984_p13 }
 0x140   : > { %994 = shalt.err (!%p991_p12)
}
 0x141   : > { %s1099_s11 = smov 128   ;;  %s1100_s12 = smov 8   ;;  %v512_v54 = vrot.slane %v511_v52, 4  ;;  %v521_v55 = vadd.f32 %v520_v51, %v519_v53 }
 0x142   : > { %879 = dma.vmem_to_hbm [thread:$0]  (%p1370_p9), %s1237_s9, 256, %s1242_s13, %s530_s14, %s1099_s11, %s1099_s11, %s1100_s12  }
 0x143   : > { %v513_v56 = vadd.f32 %v512_v54, %v511_v52  ;;  %v522_v57 = vrot.slane %v521_v55, 4  ;;  %s534_s22 = sand.u32 1, %s1149_s19   ;;  %s721_s23 = sshll.u32 %s1149_s19, 4 }
 0x144   : > { %s215_s28 = scalar_lea.vmem [#allocation6], %s1233_s27  ;;  %s221_s30 = scalar_lea.vmem [#allocation8], %s1233_s27 }
 0x145   : > { %v514_v58 = vrot.slane %v513_v56, 2  ;;  %v523_v59 = vadd.f32 %v522_v57, %v521_v55  ;;  %s567_s5 = sshll.u32 %s215_s28, 4  ;;  %s580_s6 = sshll.u32 %s221_s30, 4  ;;  %s1279_s5 = int_to_ptr.vmem [resolvable:$true] %s567_s5  ;;  %s1286_s6 = int_to_ptr.vmem [resolvable:$true] %s580_s6 }
 0x146   : > { %s1277_s14 = scalar_lea.hbm %s1358_s3, %s721_s23  ;;  %s1284_s7 = scalar_lea.hbm %s1359_s4, %s721_s23 }
 0x147   : > { %v515_v60 = vadd.f32 %v514_v58, %v513_v56  ;;  %v524_v61 = vrot.slane %v523_v59, 2  ;;  %s1288_s8 = scalar_lea.sflag [#allocation7], %s534_s22  ;;  %s995_s10 = scalar_lea.vmem %s1279_s5, 16 }
 0x148   : > { %p996_p2 = scmp.ne.s32.totalorder %s1279_s5, %s995_s10  ;;  %s1101_s11 = smov [#allocation6]  }
 0x149   : > { %v516_v62 = vrot.slane %v515_v60, 1  ;;  %v525_v63 = vadd.f32 %v524_v61, %v523_v59  ;;  %s999_s12 = sshll.u32 %s1101_s11, 4  ;;  %s1000_s12 = int_to_ptr.vmem [resolvable:$false] %s999_s12 }
 0x14a   : > { %p997_p3 = pnand %p996_p2, %p1370_p9  ;;  %s1001_s9 = scalar_lea.vmem %s1000_s12, 32 }
 0x14b   : > { %v526_v0 = vrot.slane %v525_v63, 1  ;;  %v517_v1 = vadd.f32 %v516_v62, %v515_v60  ;;  %p1002_p7 = scmp.lt.s32.totalorder %s1279_s5, %s1000_s12  ;;  %p1003_p8 = scmp.lt.s32.totalorder %s1001_s9, %s995_s10 }
 0x14c   : > { %p998_p4 = pneg %p997_p3 }
 0x14d   : > { %518 = vst [vmem:[%s215_s28] sm:$0x1] %v517_v1  ;;  %v527_v2 = vadd.f32 %v526_v0, %v525_v63  ;;  %p1004_p11 = por %p1003_p8, %p1002_p7 }
 0x14f   : > { %p1005_p13 = pnand %p1004_p11, %p998_p4 }
 0x151   : > { %1008 = shalt.err (!%p1005_p13)
}
 0x152   : > { %s1009_s22 = scalar_lea.hbm %s1277_s14, 16  ;;  %s1013_s13 = scalar_lea.hbm %s1358_s3, 32 }
 0x153   : > { %p1010_p1 = scmp.ne.s32.totalorder %s1277_s14, %s1009_s22  ;;  %p1014_p6 = scmp.lt.u32.totalorder %s1277_s14, %s1358_s3 }
 0x154   : > { %p1015_p10 = scmp.lt.u32.totalorder %s1013_s13, %s1009_s22  ;;  %p1017_p2 = scmp.lt.u32.totalorder %s1009_s22, %s1277_s14 }
 0x155   : > { %p1011_p0 = pnand %p1010_p1, %p1370_p9 }
 0x156   : > { %p1016_p12 = por %p1015_p10, %p1014_p6 }
 0x157   : > { %p1012_p5 = pneg %p1011_p0 }
 0x158   : > { %p1018_p3 = por %p1017_p2, %p1016_p12 }
 0x15a   : > { %p1019_p4 = pnand %p1018_p3, %p1012_p5 }
 0x15c   : > { %1022 = shalt.err (!%p1019_p4)
}
 0x15d   : > { %880 = dma.vmem_to_hbm [thread:$0]  (%p1370_p9), %s1279_s5, 16, %s1277_s14, %s1288_s8   ;;  %528 = vst [vmem:[%s221_s30] sm:$0x1] %v527_v2 }
 0x15e   : > { %s1023_s10 = scalar_lea.vmem %s1286_s6, 16  ;;  %s1102_s11 = smov [#allocation8]  }
 0x15f   : > { %p1024_p7 = scmp.ne.s32.totalorder %s1286_s6, %s1023_s10  ;;  %s1027_s12 = sshll.u32 %s1102_s11, 4  ;;  %s1028_s12 = int_to_ptr.vmem [resolvable:$false] %s1027_s12 }
 0x160   : > { %s1029_s9 = scalar_lea.vmem %s1028_s12, 32  ;;  %p1030_p13 = scmp.lt.s32.totalorder %s1286_s6, %s1028_s12 }
 0x161   : > { %p1025_p8 = pnand %p1024_p7, %p1370_p9  ;;  %p1031_p1 = scmp.lt.s32.totalorder %s1029_s9, %s1023_s10 }
 0x163   : > { %p1026_p11 = pneg %p1025_p8  ;;  %p1032_p0 = por %p1031_p1, %p1030_p13 }
 0x165   : > { %p1033_p5 = pnand %p1032_p0, %p1026_p11 }
 0x167   : > { %1036 = shalt.err (!%p1033_p5)
}
 0x168   : > { %s1037_s27 = scalar_lea.hbm %s1284_s7, 16  ;;  %s1041_s14 = scalar_lea.hbm %s1359_s4, 32 }
 0x169   : > { %p1038_p6 = scmp.ne.s32.totalorder %s1284_s7, %s1037_s27  ;;  %p1042_p2 = scmp.lt.u32.totalorder %s1284_s7, %s1359_s4 }
 0x16a   : > { %p1043_p3 = scmp.lt.u32.totalorder %s1041_s14, %s1037_s27  ;;  %p1045_p7 = scmp.lt.u32.totalorder %s1037_s27, %s1284_s7 }
 0x16b   : > { %p1039_p10 = pnand %p1038_p6, %p1370_p9 }
 0x16c   : > { %p1044_p4 = por %p1043_p3, %p1042_p2 }
 0x16d   : > { %p1040_p12 = pneg %p1039_p10 }
 0x16e   : > { %p1046_p8 = por %p1045_p7, %p1044_p4 }
 0x170   : > { %p1047_p11 = pnand %p1046_p8, %p1040_p12 }
 0x172   : > { %1050 = shalt.err (!%p1047_p11)
}
 0x173   : > { %881 = dma.vmem_to_hbm [thread:$0]  (%p1370_p9), %s1286_s6, 16, %s1284_s7, %s1288_s8  }
 0x174 PF: > { %p901_p13 = scmp.ge.s32.totalorder %s1093_s18, 2  ;;  %s592_s28 = sand.u32 1, %s1081_s15  }
 0x175   : > { %p1371_p1 = scmp.ne.s32.totalorder %s1364_s26, 0  ;;  %s593_s13 = scalar_lea.sflag [#allocation4], %s592_s28 }
 0x177   : > { %p890_p0 = pnand %p901_p13, %p1371_p1 }
 0x179   : > { %1072 = dma.done.wait (!%p890_p0), %s593_s13, 256  }
 0x17a   : > { %1074 = vsyncadd (!%p890_p0), %s593_s13, 4294967040  ;;  %s601_s19 = sand.u32 1, %s704_s20  }
 0x17b   : > { %s602_s29 = scalar_lea.sflag [#allocation7], %s601_s19 }
 0x17c   : > { %1076 = dma.done.wait (!%p890_p0), %s602_s29, 32  }
 0x17d   : > { %1078 = vsyncadd (!%p890_p0), %s602_s29, 4294967264  ;;  %p19_p9 = scmp.ge.s32.totalorder %s1153_s21, 4   ;;  %s1372_s15 = smov %s1085_s16 }
 0x17e   : > { %s1373_s16 = smov %s1089_s17  ;;  %s1374_s17 = smov %s1166_s24 }
 0x17f   : > { %s1375_s18 = smov %s1153_s21  ;;  %21 = sbr.rel (!%p19_p9) target bundleno = 6 (0x6), region = 102 }
 0x186   :  { %614 = vsyncpa [#allocation3], 1 }
 0x187   :  { %616 = vsyncpa [#allocation3 + $0x1], 1 }
 0x188   :  { %617 = vsyncpa [#allocation4], 1 }
 0x189   :  { %619 = vsyncpa [#allocation4 + $0x1], 1 }
 0x18a   :  { %620 = vsyncpa [#allocation7], 1 }
 0x18b   :  { %622 = vsyncpa [#allocation7 + $0x1], 1 }

</bundles_post_ra>
